<compile_context>
chip_gen: v7x
topology: tpu7x:2x2x1
jax: 0.10.0
libtpu: 0.0.40
codegen_flags: <defaults>
</compile_context>

<pallas_src>
import functools

import jax
import jax.numpy as jnp
from jax.experimental import pallas as pl
from jax.experimental.pallas import tpu as pltpu

HIDDEN = 256


def _soft_v_kernel(x_ref, w1_ref, b1_ref, w2_ref, b2_ref, w3_ref, b3_ref, o_ref):
    # x:  [TB, D]    f32          w1: [D, 256]    bf16    b1: [1, 256] f32
    # w2: [256, 256] bf16         b2: [1, 256]    f32
    # w3: [1, 256]   f32 (row)    b3: [1, 1]      f32 (SMEM scalar)
    # o:  [TB, 1]    f32
    x = x_ref[...].astype(jnp.bfloat16)              # cast in-kernel: no extra HBM pass
    h1 = jnp.dot(x, w1_ref[...], preferred_element_type=jnp.float32) + b1_ref[...]
    h1 = jnp.maximum(h1, 0.0)                        # ReLU in f32 (v5e: no bf16 VALU)
    h2 = jnp.dot(h1.astype(jnp.bfloat16), w2_ref[...],
                 preferred_element_type=jnp.float32) + b2_ref[...]
    h2 = jnp.maximum(h2, 0.0)
    # Final 256 -> 1 layer: VPU multiply + XLU lane reduction (skips an MXU pass
    # that would only use 1/256 of the array; output stays [TB, 1]).
    v = jnp.sum(h2 * w3_ref[...], axis=-1, keepdims=True) + b3_ref[0, 0]
    o_ref[...] = v.astype(o_ref.dtype)


def _round_up(n, m):
    return ((n + m - 1) // m) * m


def _choose_tile_b(batch, max_tile_b):
    """Batch tile: aim for exactly 2 grid steps (so v7x megacore can split the
    'parallel' batch axis across its two TensorCores), sublane-aligned, rounded
    to a multiple of 256 once large (keeps the dominant 256x256 layer-2 matmul
    at full MXU cadence on v6e/v7x), and capped so per-tile intermediates
    (~2.5 KB/row) stay inside the explicit 32 MiB VMEM limit on every chip
    (v5e scoped default is 16 MiB; v7x physical VMEM is 64 MiB per core)."""
    tb = _round_up(max(-(-batch // 2), 1), 8)        # cdiv(B, 2), sublane aligned
    if tb >= 256:
        tb = _round_up(tb, 256)
    return min(tb, max_tile_b)


@functools.partial(jax.jit, static_argnames=("max_tile_b",))
def soft_v_forward(x, kernel_params, *, max_tile_b=2048):
    """x: [B, obs_dim] f32 -> value: [B, 1] f32 (kernel_params from prepare_params)."""
    w1, b1, w2, b2, w3_row, b3 = kernel_params
    B, D = x.shape
    H = w1.shape[1]

    TB = _choose_tile_b(B, max_tile_b)
    grid = (pl.cdiv(B, TB),)

    # Advisory cost so XLA can schedule/overlap this small custom call.
    flops = 2 * B * (D * H + H * H + H)
    weight_bytes = sum(int(p.size) * jnp.dtype(p.dtype).itemsize
                       for p in (w1, b1, w2, b2, w3_row, b3))
    bytes_accessed = 4 * B * D + 4 * B + weight_bytes

    # Weights/biases: constant index_map -> fetched once, VMEM-resident across
    # the grid; single-buffered (Buffered(1)) since they never change.
    resident = dict(pipeline_mode=pl.Buffered(1))

    out = pl.pallas_call(
        _soft_v_kernel,
        grid=grid,
        out_shape=jax.ShapeDtypeStruct((B, 1), jnp.float32),
        in_specs=[
            pl.BlockSpec((TB, D), lambda i: (i, 0)),                # x: batch-tiled
            pl.BlockSpec((D, H), lambda i: (0, 0), **resident),     # w1
            pl.BlockSpec((1, H), lambda i: (0, 0), **resident),     # b1
            pl.BlockSpec((H, H), lambda i: (0, 0), **resident),     # w2
            pl.BlockSpec((1, H), lambda i: (0, 0), **resident),     # b2
            pl.BlockSpec((1, H), lambda i: (0, 0), **resident),     # w3 row
            pl.BlockSpec(memory_space=pltpu.MemorySpace.SMEM),      # b3: scalar in SMEM
        ],
        out_specs=pl.BlockSpec((TB, 1), lambda i: (i, 0)),
        compiler_params=pltpu.CompilerParams(
            dimension_semantics=("parallel",),      # megacore batch split on v7x
            vmem_limit_bytes=32 * 1024 * 1024,      # > v5e's 16 MiB default, < v7x's 64 MiB
        ),
        cost_estimate=pl.CostEstimate(
            flops=flops, transcendentals=0, bytes_accessed=bytes_accessed),
    )(x, w1, b1, w2, b2, w3_row, b3)
    return out


def init_params(key, obs_dim, hidden=HIDDEN):
    """Deterministic init mimicking torch.nn.Linear (U[-1/sqrt(fan_in), 1/sqrt(fan_in)]).

    Weights are stored transposed ([in, out]) relative to PyTorch's [out, in]
    so the kernel can do x @ W directly. Stored in f32 (PyTorch semantics).
    """
    def linear(k, fan_in, fan_out):
        kw, kb = jax.random.split(k)
        bound = 1.0 / jnp.sqrt(jnp.float32(fan_in))
        w = jax.random.uniform(kw, (fan_in, fan_out), jnp.float32, -bound, bound)
        b = jax.random.uniform(kb, (1, fan_out), jnp.float32, -bound, bound)
        return w, b

    k1, k2, k3 = jax.random.split(key, 3)
    w1, b1 = linear(k1, obs_dim, hidden)
    w2, b2 = linear(k2, hidden, hidden)
    w3, b3 = linear(k3, hidden, 1)
    return (w1, b1, w2, b2, w3, b3)


def prepare_params(params):
    """One-time conversion of f32 params into kernel-ready operands.

    Done OUTSIDE the per-step forward so the bf16 weight copies live in HBM and
    the per-call weight DMA is actually halved (vs. re-casting every call).
    """
    w1, b1, w2, b2, w3, b3 = params
    H = w1.shape[1]
    return (
        jax.device_put(w1.astype(jnp.bfloat16)),                 # [D, 256]
        jax.device_put(b1.reshape(1, H).astype(jnp.float32)),
        jax.device_put(w2.astype(jnp.bfloat16)),                 # [256, 256]
        jax.device_put(b2.reshape(1, H).astype(jnp.float32)),
        jax.device_put(w3.reshape(1, H).astype(jnp.float32)),    # [256,1] -> [1,256] row
        jax.device_put(b3.reshape(1, 1).astype(jnp.float32)),
    )


def reference_forward(x, params):
    w1, b1, w2, b2, w3, b3 = params
    h1 = jax.nn.relu(x @ w1 + b1)
    h2 = jax.nn.relu(h1 @ w2 + b2)
    return h2 @ w3 + b3


if __name__ == "__main__":
    key = jax.random.PRNGKey(0)
    k_params, k_x1, k_x2 = jax.random.split(key, 3)

    OBS_DIM = 16  # e.g. env.single_observation_space.shape == (16,)
    params = init_params(k_params, OBS_DIM)
    kparams = prepare_params(params)

    # Tiny inference-style batch (single padded tile, masked store).
    x_small = jax.random.normal(k_x1, (2, OBS_DIM), dtype=jnp.float32)
    out_small = jax.block_until_ready(soft_v_forward(x_small, kparams))
    ref_small = reference_forward(x_small, params)
    assert out_small.shape == (2, 1), out_small.shape
    assert jnp.allclose(out_small, ref_small, atol=2e-2, rtol=2e-2), (out_small, ref_small)

    # Two-step grid with a ragged tail (exercises the resident weights,
    # megacore-splittable batch axis, and masked tail writes).
    x_big = jax.random.normal(k_x2, (300, OBS_DIM), dtype=jnp.float32)
    out_big = jax.block_until_ready(soft_v_forward(x_big, kparams))
    ref_big = reference_forward(x_big, params)
    assert out_big.shape == (300, 1), out_big.shape
    assert jnp.allclose(out_big, ref_big, atol=2e-2, rtol=2e-2), (out_big, ref_big)

    print("KERNEL_OK")
</pallas_src>

<mosaic_0001>
module attributes {stable_mosaic.version = 11 : i64} {
  func.func @_soft_v_kernel(%arg0: i32, %arg1: memref<8x16xf32, #tpu.memory_space<vmem>>, %arg2: memref<16x256xbf16, #tpu.memory_space<vmem>>, %arg3: memref<1x256xf32, #tpu.memory_space<vmem>>, %arg4: memref<256x256xbf16, #tpu.memory_space<vmem>>, %arg5: memref<1x256xf32, #tpu.memory_space<vmem>>, %arg6: memref<1x256xf32, #tpu.memory_space<vmem>>, %arg7: memref<1x1xf32, #tpu.memory_space<smem>>, %arg8: memref<8x1xf32, #tpu.memory_space<vmem>>) attributes {dimension_semantics = [#tpu.dimension_semantics<parallel>], iteration_bounds = array<i64: 1>, scalar_prefetch = 0 : i64, scratch_operands = 0 : i64, tpu.core_type = #tpu.core_type<tc>, window_params = [{transform_indices = @transform_0, window_bounds = array<i64: 8, 16>}, {pipeline_mode = #tpu.pipeline_mode<synchronous>, transform_indices = @transform_1, window_bounds = array<i64: 16, 256>}, {pipeline_mode = #tpu.pipeline_mode<synchronous>, transform_indices = @transform_2, window_bounds = array<i64: 1, 256>}, {pipeline_mode = #tpu.pipeline_mode<synchronous>, transform_indices = @transform_3, window_bounds = array<i64: 256, 256>}, {pipeline_mode = #tpu.pipeline_mode<synchronous>, transform_indices = @transform_4, window_bounds = array<i64: 1, 256>}, {pipeline_mode = #tpu.pipeline_mode<synchronous>, transform_indices = @transform_5, window_bounds = array<i64: 1, 256>}, {transform_indices = @transform_6, window_bounds = array<i64: 1, 1>}, {transform_indices = @transform_7, window_bounds = array<i64: 8, 1>}]} {
    %c0 = arith.constant 0 : index
    %c0_0 = arith.constant 0 : index
    %0 = vector.load %arg1[%c0, %c0_0] : memref<8x16xf32, #tpu.memory_space<vmem>>, vector<8x16xf32>
    %1 = arith.truncf %0 : vector<8x16xf32> to vector<8x16xbf16>
    %c0_1 = arith.constant 0 : index
    %c0_2 = arith.constant 0 : index
    %2 = vector.load %arg2[%c0_1, %c0_2] : memref<16x256xbf16, #tpu.memory_space<vmem>>, vector<16x256xbf16>
    %cst = arith.constant dense<0.000000e+00> : vector<8x256xf32>
    %3 = tpu.matmul %1, %2, %cst {dimension_numbers = #tpu.dot_dimension_numbers<[1], [0], [0], [1], [0, 0, 1, 1], [], []>} : vector<8x16xbf16>, vector<16x256xbf16>, vector<8x256xf32> -> vector<8x256xf32>
    %c0_3 = arith.constant 0 : index
    %c0_4 = arith.constant 0 : index
    %4 = vector.load %arg3[%c0_3, %c0_4] : memref<1x256xf32, #tpu.memory_space<vmem>>, vector<1x256xf32>
    %5 = vector.broadcast %4 : vector<1x256xf32> to vector<8x256xf32>
    %6 = arith.addf %3, %5 : vector<8x256xf32>
    %cst_5 = arith.constant 0.000000e+00 : f32
    %7 = vector.broadcast %cst_5 : f32 to vector<8x256xf32>
    %8 = arith.maximumf %6, %7 : vector<8x256xf32>
    %9 = arith.truncf %8 : vector<8x256xf32> to vector<8x256xbf16>
    %c0_6 = arith.constant 0 : index
    %c0_7 = arith.constant 0 : index
    %10 = vector.load %arg4[%c0_6, %c0_7] : memref<256x256xbf16, #tpu.memory_space<vmem>>, vector<256x256xbf16>
    %cst_8 = arith.constant dense<0.000000e+00> : vector<8x256xf32>
    %11 = tpu.matmul %9, %10, %cst_8 {dimension_numbers = #tpu.dot_dimension_numbers<[1], [0], [0], [1], [0, 0, 1, 1], [], []>} : vector<8x256xbf16>, vector<256x256xbf16>, vector<8x256xf32> -> vector<8x256xf32>
    %c0_9 = arith.constant 0 : index
    %c0_10 = arith.constant 0 : index
    %12 = vector.load %arg5[%c0_9, %c0_10] : memref<1x256xf32, #tpu.memory_space<vmem>>, vector<1x256xf32>
    %13 = vector.broadcast %12 : vector<1x256xf32> to vector<8x256xf32>
    %14 = arith.addf %11, %13 : vector<8x256xf32>
    %cst_11 = arith.constant 0.000000e+00 : f32
    %15 = vector.broadcast %cst_11 : f32 to vector<8x256xf32>
    %16 = arith.maximumf %14, %15 : vector<8x256xf32>
    %c0_12 = arith.constant 0 : index
    %c0_13 = arith.constant 0 : index
    %17 = vector.load %arg6[%c0_12, %c0_13] : memref<1x256xf32, #tpu.memory_space<vmem>>, vector<1x256xf32>
    %18 = vector.broadcast %17 : vector<1x256xf32> to vector<8x256xf32>
    %19 = arith.mulf %16, %18 : vector<8x256xf32>
    %cst_14 = arith.constant dense<0.000000e+00> : vector<8xf32>
    %20 = vector.multi_reduction <add>, %19, %cst_14 [1] : vector<8x256xf32> to vector<8xf32>
    %21 = vector.shape_cast %20 : vector<8xf32> to vector<8x1xf32>
    %c0_15 = arith.constant 0 : index
    %c0_16 = arith.constant 0 : index
    %22 = memref.load %arg7[%c0_15, %c0_16] : memref<1x1xf32, #tpu.memory_space<smem>>
    %23 = vector.broadcast %22 : f32 to vector<8x1xf32>
    %24 = arith.addf %21, %23 : vector<8x1xf32>
    %c0_17 = arith.constant 0 : index
    %c0_18 = arith.constant 0 : index
    %25 = vector.load %arg8[%c0_17, %c0_18] : memref<8x1xf32, #tpu.memory_space<vmem>>, vector<8x1xf32>
    tpu.vector_store %arg8[%c0_17, %c0_18], %24 {strides = array<i32>} : memref<8x1xf32, #tpu.memory_space<vmem>>, vector<8x1xf32>,
    return
  }
  func.func @transform_0(%arg0: i32) -> (i32, i32) {
    %c0_i32 = arith.constant 0 : i32
    %c0_i32_0 = arith.constant 0 : i32
    return %arg0, %c0_i32 : i32, i32
  }
  func.func @transform_1(%arg0: i32) -> (i32, i32) {
    %c0_i32 = arith.constant 0 : i32
    %c0_i32_0 = arith.constant 0 : i32
    %c0_i32_1 = arith.constant 0 : i32
    return %c0_i32, %c0_i32_0 : i32, i32
  }
  func.func @transform_2(%arg0: i32) -> (i32, i32) {
    %c0_i32 = arith.constant 0 : i32
    %c0_i32_0 = arith.constant 0 : i32
    %c0_i32_1 = arith.constant 0 : i32
    return %c0_i32, %c0_i32_0 : i32, i32
  }
  func.func @transform_3(%arg0: i32) -> (i32, i32) {
    %c0_i32 = arith.constant 0 : i32
    %c0_i32_0 = arith.constant 0 : i32
    %c0_i32_1 = arith.constant 0 : i32
    return %c0_i32, %c0_i32_0 : i32, i32
  }
  func.func @transform_4(%arg0: i32) -> (i32, i32) {
    %c0_i32 = arith.constant 0 : i32
    %c0_i32_0 = arith.constant 0 : i32
    %c0_i32_1 = arith.constant 0 : i32
    return %c0_i32, %c0_i32_0 : i32, i32
  }
  func.func @transform_5(%arg0: i32) -> (i32, i32) {
    %c0_i32 = arith.constant 0 : i32
    %c0_i32_0 = arith.constant 0 : i32
    %c0_i32_1 = arith.constant 0 : i32
    return %c0_i32, %c0_i32_0 : i32, i32
  }
  func.func @transform_6(%arg0: i32) -> (i32, i32) {
    %c0_i32 = arith.constant 0 : i32
    %c0_i32_0 = arith.constant 0 : i32
    %c0_i32_1 = arith.constant 0 : i32
    return %c0_i32, %c0_i32_0 : i32, i32
  }
  func.func @transform_7(%arg0: i32) -> (i32, i32) {
    %c0_i32 = arith.constant 0 : i32
    %c0_i32_0 = arith.constant 0 : i32
    return %arg0, %c0_i32 : i32, i32
  }
}

</mosaic_0001>

<bundles_post_ra>
// kernel: soft_v_forward.1
= control target key start
LH: loop header
LB: loop body
LE: loop exit
PB: predicated region body
PF: predicated region fallthrough
CT: control target
= control target key end

     0   :  { %13 = vsyncpa [#allocation4], 0  ;;  %s667_s0 = inlined_call_operand.vmem [shape: f32[2,16], index: 0, kind: input, shape index: {}]   ;;  %s668_s1 = inlined_call_operand.hbm [shape: bf16[16,256], index: 1, kind: input, shape index: {}]   ;;  %s669_s2 = inlined_call_operand.vmem [shape: f32[1,256], index: 2, kind: input, shape index: {}]   ;;  %s670_s3 = inlined_call_operand.hbm [shape: bf16[256,256], index: 3, kind: input, shape index: {}]   ;;  %s671_s4 = inlined_call_operand.vmem [shape: f32[1,256], index: 4, kind: input, shape index: {}]   ;;  %s672_s5 = inlined_call_operand.vmem [shape: f32[1,256], index: 5, kind: input, shape index: {}]   ;;  %s673_s6 = inlined_call_operand.<no memory space> [shape: f32[1,1], index: 6, kind: input, shape index: {}]   ;;  %s674_s7 = inlined_call_operand.vmem [shape: f32[2,1], index: 7, kind: output, shape index: {}]  }
   0x1   :  { %14 = vsyncpa [#allocation6], 0  ;;  %s580_s24 = smov [#allocation3]   ;;  %s532_s28 = scalar_lea.hbm %s668_s1, 256 }
   0x2   :  { %s22_s25 = sshll.u32 %s580_s24, 4  ;;  %p533_p0 = scmp.ne.s32.totalorder %s668_s1, %s532_s28  ;;  %s23_s25 = int_to_ptr.vmem [resolvable:$true] %s22_s25 }
   0x3   :  { %p536_p1 = scmp.lt.u32.totalorder %s532_s28, %s668_s1 }
   0x5   :  { %p538_p2 = pnand %p536_p1, %p533_p0 }
   0x7   :  { %541 = shalt.err (!%p538_p2)
}
   0x8   :  { %s542_s10 = scalar_lea.vmem %s23_s25, 256  ;;  %p547_p4 = scmp.lt.s32.totalorder %s23_s25, %s23_s25 }
   0x9   :  { %p543_p3 = scmp.ne.s32.totalorder %s23_s25, %s542_s10  ;;  %p548_p5 = scmp.lt.s32.totalorder %s542_s10, %s542_s10 }
   0xb   :  { %p549_p6 = por %p548_p5, %p547_p4 }
   0xd   :  { %p550_p7 = pnand %p549_p6, %p543_p3 }
   0xf   :  { %553 = shalt.err (!%p550_p7)
}
  0x10   :  { %s581_s11 = smov 128   ;;  %s582_s12 = smov 8  }
  0x11   :  { %28 = dma.hbm_to_vmem [thread:$0]  %s668_s1, 256, %s23_s25, [#allocation4], %s581_s11, %s581_s11, %s582_s12  }
  0x12   :  { %s583_s15 = smov [#allocation5]   ;;  %s554_s19 = scalar_lea.hbm %s670_s3, 4096 }
  0x13   :  { %s36_s16 = sshll.u32 %s583_s15, 4  ;;  %p555_p8 = scmp.ne.s32.totalorder %s670_s3, %s554_s19  ;;  %s37_s16 = int_to_ptr.vmem [resolvable:$true] %s36_s16 }
  0x14   :  { %p558_p9 = scmp.lt.u32.totalorder %s554_s19, %s670_s3 }
  0x16   :  { %p560_p10 = pnand %p558_p9, %p555_p8 }
  0x18   :  { %563 = shalt.err (!%p560_p10)
}
  0x19   :  { %s564_s24 = scalar_lea.vmem %s37_s16, 4096  ;;  %p569_p12 = scmp.lt.s32.totalorder %s37_s16, %s37_s16 }
  0x1a   :  { %p565_p11 = scmp.ne.s32.totalorder %s37_s16, %s564_s24  ;;  %p570_p13 = scmp.lt.s32.totalorder %s564_s24, %s564_s24 }
  0x1c   :  { %p571_p0 = por %p570_p13, %p569_p12 }
  0x1e   :  { %p572_p1 = pnand %p571_p0, %p565_p11 }
  0x20   :  { %575 = shalt.err (!%p572_p1)
}
  0x21   :  { %42 = dma.hbm_to_vmem [thread:$0]  %s670_s3, 4096, %s37_s16, [#allocation6], %s581_s11, %s581_s11, %s582_s12  }
  0x22   :  { %576 = dma.done.wait [#allocation4], 256  }
  0x23   :  { %577 = vsyncadd [#allocation4], 4294967040 }
  0x24   :  { %578 = dma.done.wait [#allocation6], 4096  }
  0x25   :  { %579 = vsyncadd [#allocation6], 4294963200  ;;  %v584_v0 = vmov 0   ;;  %v481_v1 = vld [vmem:[#allocation3 + $0x4] ss:$8 sps:$4 sm:$0xff]   ;;  %vm82_vm0 = vcmask 130048   ;;  %v62_v37 = vlaneseq }
  0x26   :  { %118 = vmatprep.mubr.bf16.mxu0 %v584_v0  ;;  %v483_v2 = vld [vmem:[#allocation3] ss:$8 sps:$4 sm:$0xff]   ;;  %86 = vmatprep.subr.bf16.mxu0 %v481_v1  ;;  %v484_v5 = vld [vmem:[#allocation5 + $0x4] ss:$8 sps:$4 sm:$0xff]   ;;  %v486_v6 = vld [vmem:[#allocation5] ss:$8 sps:$4 sm:$0xff]  }
  0x27   :  { %v56_v3 = vld [vmem:[%s667_s0] sm:$0xff]  ;;  %87 = vmatpush1.bf16.msra.mxu0 %v483_v2  ;;  %335 = vmatprep.subr.bf16.mxu1 %v484_v5  ;;  %v490_v9 = vld [vmem:[#allocation5 + $0x24] ss:$8 sps:$4 sm:$0xff]   ;;  %v492_v10 = vld [vmem:[#allocation5 + $0x20] ss:$8 sps:$4 sm:$0xff]   ;;  %v63_v38 = vshrl.u32 %v62_v37, 7 }
  0x28   :  { %v57_v4 = vpack.c.bf16 %v56_v3, %v56_v3  ;;  %v487_v7 = vld [vmem:[#allocation5 + $0x14] ss:$8 sps:$4 sm:$0xff]   ;;  %336 = vmatpush1.bf16.msra.mxu1 %v486_v6  ;;  %v489_v8 = vld [vmem:[#allocation5 + $0x10] ss:$8 sps:$4 sm:$0xff]   ;;  %v496_v13 = vld [vmem:[#allocation5 + $0x44] ss:$8 sps:$4 sm:$0xff]  }
  0x29   :  { %337 = vmatprep.subr.bf16.mxu1 %v487_v7  ;;  %v493_v11 = vld [vmem:[#allocation5 + $0x34] ss:$8 sps:$4 sm:$0xff]   ;;  %v495_v12 = vld [vmem:[#allocation5 + $0x30] ss:$8 sps:$4 sm:$0xff]   ;;  %v498_v14 = vld [vmem:[#allocation5 + $0x40] ss:$8 sps:$4 sm:$0xff]   ;;  %v396_v7 = vstv %s673_s6 }
  0x2a   :  { %443 = vmatmul.mubr.msk.bf16.vlgmr.msra.gmra.mrb[0].mxu0 %vm82_vm0, %v57_v4  ;;  %v499_v15 = vld [vmem:[#allocation5 + $0x54] ss:$8 sps:$4 sm:$0xff]   ;;  %v501_v16 = vld [vmem:[#allocation5 + $0x50] ss:$8 sps:$4 sm:$0xff]   ;;  %v502_v17 = vld [vmem:[#allocation5 + $0x64] ss:$8 sps:$4 sm:$0xff]  }
  0x2b   :  { %v504_v18 = vld [vmem:[#allocation5 + $0x60] ss:$8 sps:$4 sm:$0xff]   ;;  %v505_v19 = vld [vmem:[#allocation5 + $0x74] ss:$8 sps:$4 sm:$0xff]   ;;  %v507_v20 = vld [vmem:[#allocation5 + $0x70] ss:$8 sps:$4 sm:$0xff]  }
  0x2c   :  { %338 = vmatpush1.bf16.msra.mxu1 %v489_v8  ;;  %v508_v21 = vld [vmem:[#allocation5 + $0x84] ss:$8 sps:$4 sm:$0xff]   ;;  %v510_v22 = vld [vmem:[#allocation5 + $0x80] ss:$8 sps:$4 sm:$0xff]   ;;  %v511_v23 = vld [vmem:[#allocation5 + $0x94] ss:$8 sps:$4 sm:$0xff]  }
  0x2d   :  { %339 = vmatprep.subr.bf16.mxu1 %v490_v9  ;;  %v513_v24 = vld [vmem:[#allocation5 + $0x90] ss:$8 sps:$4 sm:$0xff]   ;;  %v514_v25 = vld [vmem:[#allocation5 + $0xa4] ss:$8 sps:$4 sm:$0xff]   ;;  %v516_v26 = vld [vmem:[#allocation5 + $0xa0] ss:$8 sps:$4 sm:$0xff]  }
  0x2e   :  { %v517_v27 = vld [vmem:[#allocation5 + $0xb4] ss:$8 sps:$4 sm:$0xff]   ;;  %v519_v28 = vld [vmem:[#allocation5 + $0xb0] ss:$8 sps:$4 sm:$0xff]   ;;  %v520_v29 = vld [vmem:[#allocation5 + $0xc4] ss:$8 sps:$4 sm:$0xff]  }
  0x2f   :  { %v522_v30 = vld [vmem:[#allocation5 + $0xc0] ss:$8 sps:$4 sm:$0xff]   ;;  %v523_v31 = vld [vmem:[#allocation5 + $0xd4] ss:$8 sps:$4 sm:$0xff]   ;;  %v525_v32 = vld [vmem:[#allocation5 + $0xd0] ss:$8 sps:$4 sm:$0xff]  }
  0x30   :  { %340 = vmatpush1.bf16.msra.mxu1 %v492_v10  ;;  %v526_v33 = vld [vmem:[#allocation5 + $0xe4] ss:$8 sps:$4 sm:$0xff]   ;;  %v528_v34 = vld [vmem:[#allocation5 + $0xe0] ss:$8 sps:$4 sm:$0xff]   ;;  %v529_v35 = vld [vmem:[#allocation5 + $0xf4] ss:$8 sps:$4 sm:$0xff]  }
  0x31   :  { %341 = vmatprep.subr.bf16.mxu1 %v493_v11  ;;  %v531_v36 = vld [vmem:[#allocation5 + $0xf0] ss:$8 sps:$4 sm:$0xff]   ;;  %v64_v39 = vsub.s32 0, %v63_v38  ;;  %v68_v41 = vsub.s32 1, %v63_v38  ;;  %vm398_vm1 = vcmask 7168  }
  0x32   :  { %v60_v40 = vld [vmem:[%s669_s2] sm:$0x3] }
  0x33   :  { %v65_v42 = vrot.slane %v60_v40, %v64_v39  ;;  %v69_v43 = vrot.slane %v60_v40, %v68_v41  ;;  %v163_v54 = vld [vmem:[%s671_s4] sm:$0x3] }
  0x34   :  { %342 = vmatpush1.bf16.msra.mxu1 %v495_v12  ;;  %v168_v55 = vrot.slane %v163_v54, %v64_v39  ;;  %v172_v56 = vrot.slane %v163_v54, %v68_v41  ;;  %v378_v57 = vld [vmem:[%s672_s5] sm:$0x3] }
  0x35   :  { %343 = vmatprep.subr.bf16.mxu1 %v496_v13  ;;  %v383_v61 = vrot.slane %v378_v57, %v64_v39  ;;  %v387_v0 = vrot.slane %v378_v57, %v68_v41 }
  0x38   :  { %344 = vmatpush1.bf16.msra.mxu1 %v498_v14 }
  0x39   :  { %345 = vmatprep.subr.bf16.mxu1 %v499_v15 }
  0x3c   :  { %346 = vmatpush1.bf16.msra.mxu1 %v501_v16 }
  0x3d   :  { %347 = vmatprep.subr.bf16.mxu1 %v502_v17 }
  0x40   :  { %348 = vmatpush1.bf16.msra.mxu1 %v504_v18 }
  0x41   :  { %349 = vmatprep.subr.bf16.mxu1 %v505_v19 }
  0x44   :  { %350 = vmatpush1.bf16.msra.mxu1 %v507_v20 }
  0x45   :  { %351 = vmatprep.subr.bf16.mxu1 %v508_v21 }
  0x48   :  { %352 = vmatpush1.bf16.msra.mxu1 %v510_v22 }
  0x49   :  { %353 = vmatprep.subr.bf16.mxu1 %v511_v23 }
  0x4c   :  { %354 = vmatpush1.bf16.msra.mxu1 %v513_v24 }
  0x4d   :  { %355 = vmatprep.subr.bf16.mxu1 %v514_v25 }
  0x50   :  { %356 = vmatpush1.bf16.msra.mxu1 %v516_v26 }
  0x51   :  { %357 = vmatprep.subr.bf16.mxu1 %v517_v27 }
  0x54   :  { %358 = vmatpush1.bf16.msra.mxu1 %v519_v28 }
  0x55   :  { %359 = vmatprep.subr.bf16.mxu1 %v520_v29 }
  0x58   :  { %360 = vmatpush1.bf16.msra.mxu1 %v522_v30 }
  0x59   :  { %361 = vmatprep.subr.bf16.mxu1 %v523_v31 }
  0x5c   :  { %362 = vmatpush1.bf16.msra.mxu1 %v525_v32 }
  0x5d   :  { %363 = vmatprep.subr.bf16.mxu1 %v526_v33 }
  0x60   :  { %364 = vmatpush1.bf16.msra.mxu1 %v528_v34 }
  0x61   :  { %365 = vmatprep.subr.bf16.mxu1 %v529_v35 }
  0x64   :  { %366 = vmatpush1.bf16.msra.mxu1 %v531_v36 }
  0xfd   :  { %v120_v44 = vpop.f32.mrb[0].mxu0 }
  0xfe   :  { %v121_v45 = vadd.f32 %v120_v44, %v65_v42  ;;  %v122_v46 = vpop.f32.mrb[1].mxu0 }
  0xff   :  { %v123_v47 = vadd.f32 %v122_v46, %v69_v43  ;;  %v124_v48 = vpop.f32.mrb[2].mxu0 }
 0x100   :  { %v127_v49 = vmax.f32 %v121_v45, 0.0  ;;  %v125_v50 = vpop.f32.mrb[3].mxu0 }
 0x101   :  { %v128_v51 = vmax.f32 %v123_v47, 0.0 }
 0x102   :  { %v129_v53 = vpack.c.bf16 %v127_v49, %v127_v49 }
 0x103   :  { %v130_v52 = vpack.c.bf16 %v128_v51, %v128_v51 }
 0x105   :  { %367 = vmatprep.mubr.bf16.mxu1 %v130_v52 }
 0x106   :  { %368 = vmatmul.mubr.bf16.vlgmr.msra.gmra.mrb[0].mxu1 %v129_v53 }
 0x1d9   :  { %v369_v58 = vpop.f32.mrb[0].mxu1 }
 0x1da   :  { %v370_v59 = vadd.f32 %v369_v58, %v168_v55  ;;  %v371_v60 = vpop.f32.mrb[1].mxu1 }
 0x1db   :  { %v372_v62 = vadd.f32 %v371_v60, %v172_v56  ;;  %v373_v63 = vpop.f32.mrb[2].mxu1 }
 0x1dc   :  { %v376_v1 = vmax.f32 %v370_v59, 0.0  ;;  %v374_v2 = vpop.f32.mrb[3].mxu1 }
 0x1dd   :  { %v377_v3 = vmax.f32 %v372_v62, 0.0 }
 0x1de   :  { %v390_v4 = vmul.f32 %v383_v61, %v376_v1 }
 0x1df   :  { %v391_v5 = vmul.f32 %v387_v0, %v377_v3 }
 0x1e1   :  { %v392_v6 = vadd.f32 %v391_v5, %v390_v4 }
 0x1e3   :  { %393 = vadd.xlane.f32.xlu0 %v392_v6 }
 0x270   :  { %v394_v8 = vpop.xlane.xlu0 %393 }
 0x271   :  { %v397_v9 = vadd.f32 %v396_v7, %v394_v8 }
 0x273   :  { %399 = vst.msk [vmem:[#allocation7] sm:$0xff] %vm398_vm1, %v397_v9 }
 0x27a   :  { %v417_v10 = vld [vmem:[#allocation7] sm:$0x3] }
 0x27b   :  { %418 = vst [vmem:[%s674_s7] sm:$0x3] %v417_v10 }
 0x27c   :  { %435 = vsyncpa [#allocation4], 1 }
 0x27d   :  { %436 = vsyncpa [#allocation6], 1 }

</bundles_post_ra>
